<compile_context>
chip_gen: v7x
topology: tpu7x:2x2x1
jax: 0.10.0
libtpu: 0.0.40
codegen_flags: <defaults>
</compile_context>

<pallas_src>
import numpy as np
import jax
import jax.numpy as jnp
from jax.experimental import pallas as pl
from jax.experimental.pallas import tpu as pltpu


# ---------------------------------------------------------------------------
# Glue: exact linear operators for AdaptiveAvgPool2d / bilinear upsample.
# ---------------------------------------------------------------------------
def adaptive_avg_pool_matrix(out_size: int, in_size: int) -> np.ndarray:
    """PyTorch AdaptiveAvgPool semantics along one axis: (out_size, in_size)."""
    m = np.zeros((out_size, in_size), np.float64)
    for i in range(out_size):
        start = (i * in_size) // out_size
        end = -(-((i + 1) * in_size) // out_size)  # ceil((i+1)*in/out)
        m[i, start:end] = 1.0 / (end - start)
    return m


def bilinear_upsample_matrix(out_size: int, in_size: int) -> np.ndarray:
    """F.interpolate(mode='bilinear', align_corners=True) along one axis.

    Every row sums to 1 -- the bias-through-upsample fold below relies on this.
    """
    m = np.zeros((out_size, in_size), np.float64)
    if in_size == 1:
        m[:, 0] = 1.0
        return m
    scale = 0.0 if out_size == 1 else (in_size - 1) / (out_size - 1)
    for o in range(out_size):
        src = o * scale
        i0 = min(int(np.floor(src)), in_size - 1)
        i1 = min(i0 + 1, in_size - 1)
        frac = src - i0
        m[o, i0] += 1.0 - frac
        m[o, i1] += frac
    return m


def build_psp_operands(w_stage, a_stage, b_stage, w_bot, a_bot, b_bot, sizes, H, W):
    """Fold BN + bottleneck into per-stage weights and stack the spatial operators.

    Folding is done in float64 numpy so kernel-vs-reference differences are due only to
    MXU precision.  Returns float32 jnp arrays:
      pt      (H*W, Ptot)   stacked pool operators (transposed), Ptot = sum(sz^2)
      ut      (Ptot, H*W)   stacked upsample operators (transposed)
      wct_cat (S*Fo, C)     stacked fused per-stage weight: diag(a_bot) @ Wb_s @ diag(a_s) @ Ws
      wft     (Fo, C)       fused identity-branch weight: diag(a_bot) @ Wb_feats
      masks   (S, 1, Ptot)  0/1 column selectors for each stage's pooled block
      bias    (Fo, 1)       fused bias: a_bot * sum_s(Wb_s @ b_s) + b_bot
    """
    S = len(sizes)
    Fo_s = w_stage.shape[1]          # stage conv out channels
    Fo = w_bot.shape[0]              # bottleneck out channels
    C = w_stage.shape[2]

    w_stage = np.asarray(w_stage, np.float64)
    a_stage = np.asarray(a_stage, np.float64)
    b_stage = np.asarray(b_stage, np.float64)
    w_bot = np.asarray(w_bot, np.float64)
    a_bot = np.asarray(a_bot, np.float64).reshape(Fo)
    b_bot = np.asarray(b_bot, np.float64).reshape(Fo)

    pt_blocks, ut_blocks = [], []
    for sz in sizes:
        P = np.kron(adaptive_avg_pool_matrix(sz, H), adaptive_avg_pool_matrix(sz, W))  # (sz^2, HW)
        U = np.kron(bilinear_upsample_matrix(H, sz), bilinear_upsample_matrix(W, sz))  # (HW, sz^2)
        # The bias-through-upsample fold below requires every upsample row to sum to 1
        # (true for bilinear align_corners=True).  Guard it so a future mode swap cannot
        # silently corrupt the fused bias.
        assert np.allclose(U.sum(axis=1), 1.0, atol=1e-10), \
            "upsample rows must sum to 1 for the fused-bias fold (align_corners=True)"
        pt_blocks.append(P.T)        # (HW, sz^2)
        ut_blocks.append(U.T)        # (sz^2, HW)
    Ptot = sum(sz * sz for sz in sizes)
    pt = np.concatenate(pt_blocks, axis=1)       # (HW, Ptot)
    ut = np.concatenate(ut_blocks, axis=0)       # (Ptot, HW)

    masks = np.zeros((S, 1, Ptot), np.float64)
    off = 0
    for s, sz in enumerate(sizes):
        masks[s, 0, off:off + sz * sz] = 1.0
        off += sz * sz

    wct = np.empty((S, Fo, C), np.float64)
    bias = b_bot.copy()
    for s in range(S):
        W_bs = w_bot[:, s * Fo_s:(s + 1) * Fo_s]                       # (Fo, Fo_s)
        wct[s] = (a_bot[:, None] * (W_bs * a_stage[s][None, :])) @ w_stage[s]
        bias += a_bot * (W_bs @ b_stage[s])      # rows of U sum to 1 => bias passes through
    wct_cat = wct.reshape(S * Fo, C)             # stacked: one matmul instead of S small ones
    wft = a_bot[:, None] * w_bot[:, S * Fo_s:]                         # (Fo, C)

    to32 = lambda a: jnp.asarray(np.asarray(a, np.float32))
    return (to32(pt), to32(ut), to32(wct_cat), to32(wft), to32(masks),
            to32(bias.reshape(Fo, 1)))


# ---------------------------------------------------------------------------
# Pallas kernel: grid = (batch, C-tiles); everything accumulated in f32 VMEM scratch.
# ---------------------------------------------------------------------------
def psp_kernel(x_ref, wct_ref, wft_ref, pt_ref, ut_ref, mask_ref, bias_ref,
               out_ref, yacc_ref, iacc_ref):
    # x_ref:    (TC, HWp)     bf16 C-slice of one batch element (channels-first, flat HW)
    # wct_ref:  (S*Fo, TC)    bf16 stacked fused per-stage 1x1 conv weights, C-slice
    # wft_ref:  (Fo, TC)      bf16 fused identity-branch 1x1 conv weights, C-slice
    # pt_ref:   (HWp, Ptot)   bf16 stacked adaptive-avg-pool operators     (grid-invariant)
    # ut_ref:   (Ptot, HWp)   bf16 stacked bilinear-upsample operators     (grid-invariant)
    # mask_ref: (S, 1, Ptot)  f32  per-stage 0/1 column masks              (grid-invariant)
    # bias_ref: (Fo, 1)       f32  fused bias                              (grid-invariant)
    # out_ref:  (Fo, HWp)     f32  lane-dense output block (written at the last C-tile)
    # yacc_ref: (S*Fo, Ptot)  f32  scratch accumulator over C-tiles (pyramid branch)
    # iacc_ref: (Fo, HWp)     f32  scratch accumulator over C-tiles (identity branch)
    f32 = jnp.float32
    c = pl.program_id(1)

    @pl.when(c == 0)
    def _init():
        yacc_ref[...] = jnp.zeros_like(yacc_ref)
        iacc_ref[...] = jnp.zeros_like(iacc_ref)

    x = x_ref[...]                                                       # (TC, HWp) bf16

    # One pooling matmul covering all pyramid levels, for this C-slice.
    pooled = jnp.dot(x, pt_ref[...], preferred_element_type=f32)        # (TC, Ptot) f32

    # Single stacked per-stage 1x1 conv matmul (replaces 4 small masked matmuls).
    yacc_ref[...] += jnp.dot(wct_ref[...], pooled.astype(wct_ref.dtype),
                             preferred_element_type=f32)                # (S*Fo, Ptot)

    # Identity (feats) branch partial sum over this C-slice.
    iacc_ref[...] += jnp.dot(wft_ref[...], x, preferred_element_type=f32)  # (Fo, HWp)

    @pl.when(c == pl.num_programs(1) - 1)
    def _finalize():
        num_stages = mask_ref.shape[0]
        fo = out_ref.shape[0]
        y_cat = yacc_ref[...]                                            # (S*Fo, Ptot)
        # Mask-sum the sublane-aligned per-stage slices (disjoint pooled-column blocks).
        y = mask_ref[0] * y_cat[0:fo, :]
        for s in range(1, num_stages):
            y = y + mask_ref[s] * y_cat[s * fo:(s + 1) * fo, :]
        # One stacked upsample matmul + identity branch + fused bias; ReLU.
        acc = jnp.dot(y.astype(ut_ref.dtype), ut_ref[...],
                      preferred_element_type=f32)                        # (Fo, HWp)
        acc = acc + iacc_ref[...] + bias_ref[...]
        out_ref[...] = jnp.maximum(acc, 0.0)    # Dropout2d(0.1) is identity in eval


# ---------------------------------------------------------------------------
# Wrapper
# ---------------------------------------------------------------------------
def _round_up(x, m):
    return ((x + m - 1) // m) * m


def _pick_c_tile(C):
    # Per-generation retune point: ~256-512 keeps v7x (64 MiB VMEM) happy at C=2048;
    # v5e/v6e (128 MiB) could use 1024 / full C for a larger MXU K per pass.
    if C <= 512:
        return C
    for tc in (512, 256, 128):
        if C % tc == 0:
            return tc
    return C


def _vmem_limit_bytes():
    # ~7/8 of physical VMEM, capped at 100 MiB  =>  ~56 MiB on v7x, 100 MiB on v5e/v6e.
    try:
        cap = getattr(pltpu.get_tpu_info(), "vmem_capacity_bytes", None)
        if not cap:
            return None
        return min(int(cap) * 7 // 8, 100 * 1024 * 1024)
    except Exception:
        return None


def _psp_pallas_call(x2, wct_cat, wft, pt, ut, masks, bias, *, tc, single_buffer_shared):
    N, C, HWp = x2.shape
    SFo = wct_cat.shape[0]
    Fo = wft.shape[0]
    Ptot = masks.shape[2]
    n_c = C // tc

    def shared_spec(arr):
        nd = arr.ndim
        kwargs = {}
        if single_buffer_shared:
            # Grid-invariant block: default 2-deep pipelining only doubles its VMEM
            # footprint for nothing -> request a single buffer.
            kwargs["pipeline_mode"] = pl.Buffered(1)
        return pl.BlockSpec(arr.shape, lambda n, c, _nd=nd: (0,) * _nd, **kwargs)

    in_specs = [
        pl.BlockSpec((None, tc, HWp), lambda n, c: (n, c, 0)),   # x (C-sliced, pipelined)
        pl.BlockSpec((SFo, tc), lambda n, c: (0, c)),            # wct_cat (C-sliced)
        pl.BlockSpec((Fo, tc), lambda n, c: (0, c)),             # wft (C-sliced)
        shared_spec(pt), shared_spec(ut), shared_spec(masks), shared_spec(bias),
    ]
    out_spec = pl.BlockSpec((None, Fo, HWp), lambda n, c: (n, 0, 0))

    flops = int(2 * N * (C * HWp * Ptot + SFo * C * Ptot + Fo * Ptot * HWp + Fo * C * HWp))
    bytes_accessed = int(
        x2.size * x2.dtype.itemsize
        + N * (wct_cat.size * wct_cat.dtype.itemsize + wft.size * wft.dtype.itemsize)
        + pt.size * pt.dtype.itemsize + ut.size * ut.dtype.itemsize
        + masks.size * masks.dtype.itemsize + bias.size * bias.dtype.itemsize
        + N * Fo * HWp * 4)

    return pl.pallas_call(
        psp_kernel,
        out_shape=jax.ShapeDtypeStruct((N, Fo, HWp), jnp.float32),
        grid=(N, n_c),
        in_specs=in_specs,
        out_specs=out_spec,
        scratch_shapes=[pltpu.VMEM((SFo, Ptot), jnp.float32),   # pyramid-branch accumulator
                        pltpu.VMEM((Fo, HWp), jnp.float32)],    # identity-branch accumulator
        compiler_params=pltpu.CompilerParams(
            # batch axis feeds both v7x TensorCores; C axis is a reduction (accumulators).
            dimension_semantics=("parallel", "arbitrary"),
            vmem_limit_bytes=_vmem_limit_bytes()),
        cost_estimate=pl.CostEstimate(flops=flops, transcendentals=0,
                                      bytes_accessed=bytes_accessed),
    )(x2, wct_cat, wft, pt, ut, masks, bias)


def psp_forward(x_nchw, pt, ut, wct_cat, wft, masks, bias):
    N, C, H, W = x_nchw.shape
    HW = H * W
    HWp = _round_up(HW, 128)          # lane-dense stores even for e.g. 60x60 -> 3712
    Fo = wft.shape[0]

    x2 = x_nchw.reshape(N, C, HW)     # free XLA reshape (channels-first, HW on lanes)
    if HWp != HW:
        x2 = jnp.pad(x2, ((0, 0), (0, 0), (0, HWp - HW)))
        pt = jnp.pad(pt, ((0, HWp - HW), (0, 0)))   # padded pixels contribute 0 to pooling
        ut = jnp.pad(ut, ((0, 0), (0, HWp - HW)))   # padded output columns are sliced away

    # bf16 operands: default MXU precision already rounds f32 operands to bf16 per pass,
    # so this halves HBM traffic / VMEM with no additional accuracy loss.  Accumulate f32.
    bf16 = jnp.bfloat16
    x2b = x2.astype(bf16)
    pt_b, ut_b = pt.astype(bf16), ut.astype(bf16)
    wct_b, wft_b = wct_cat.astype(bf16), wft.astype(bf16)

    tc = _pick_c_tile(C)
    args = (x2b, wct_b, wft_b, pt_b, ut_b, masks, bias)
    try:
        out = _psp_pallas_call(*args, tc=tc, single_buffer_shared=True)
    except Exception:
        # This jax/Mosaic build rejected pipeline_mode=pl.Buffered(1) on the shared
        # operands -> fall back to default double-buffering (VMEM cost only; identical math).
        out = _psp_pallas_call(*args, tc=tc, single_buffer_shared=False)

    if HWp != HW:
        out = out[:, :, :HW]
    return out.reshape(N, Fo, H, W)   # NCHW, same layout as the PyTorch module


# ---------------------------------------------------------------------------
# Pure-JAX reference (unfused, HIGHEST precision) used to validate the kernel.
# ---------------------------------------------------------------------------
def psp_reference(x_nchw, w_stage, a_stage, b_stage, w_bot, a_bot, b_bot, sizes):
    N, C, H, W = x_nchw.shape
    hp = jax.lax.Precision.HIGHEST
    x2 = x_nchw.reshape(N, C, H * W)
    priors = []
    for s, sz in enumerate(sizes):
        P = jnp.asarray(np.kron(adaptive_avg_pool_matrix(sz, H),
                                adaptive_avg_pool_matrix(sz, W)).astype(np.float32))
        U = jnp.asarray(np.kron(bilinear_upsample_matrix(H, sz),
                                bilinear_upsample_matrix(W, sz)).astype(np.float32))
        pooled = jnp.einsum('ncq,pq->ncp', x2, P, precision=hp)              # AdaptiveAvgPool2d
        y = jnp.einsum('fc,ncp->nfp', w_stage[s], pooled, precision=hp)      # 1x1 conv (no bias)
        y = y * a_stage[s][None, :, None] + b_stage[s][None, :, None]        # BN (eval)
        z = jnp.einsum('qp,nfp->nfq', U, y, precision=hp)                    # bilinear, align_corners
        priors.append(z)
    cat = jnp.concatenate(priors + [x2], axis=1)                             # (N, S*Fo + C, HW)
    o = jnp.einsum('fk,nkq->nfq', w_bot, cat, precision=hp)                  # bottleneck 1x1 conv
    o = o * a_bot.reshape(1, -1, 1) + b_bot.reshape(1, -1, 1)                # BN (eval)
    o = jnp.maximum(o, 0.0)                                                  # ReLU; Dropout eval = id
    return o.reshape(N, -1, H, W)


if __name__ == "__main__":
    # Small shapes consistent with the module: features=4, out_features=8, sizes=(1,2,3,6)
    N, C, H, W = 2, 4, 16, 16
    Fo = 8
    sizes = (1, 2, 3, 6)
    S = len(sizes)
    Ctot = C + S * Fo
    eps = 1e-5

    key = jax.random.PRNGKey(0)
    keys = jax.random.split(key, 12)

    feats = jax.random.normal(keys[0], (N, C, H, W), jnp.float32)   # NCHW, like the PyTorch module

    # Stage 1x1 conv weights, PyTorch layout (out, in)
    w_stage = 0.2 * jax.random.normal(keys[1], (S, Fo, C), jnp.float32)
    # Stage BatchNorm (inference) folded to affine a*x + b
    g_s = 1.0 + 0.1 * jax.random.normal(keys[2], (S, Fo), jnp.float32)
    beta_s = 0.1 * jax.random.normal(keys[3], (S, Fo), jnp.float32)
    mu_s = 0.05 * jax.random.normal(keys[4], (S, Fo), jnp.float32)
    var_s = 1.0 + 0.1 * jax.random.uniform(keys[5], (S, Fo), jnp.float32)
    a_stage = g_s / jnp.sqrt(var_s + eps)
    b_stage = beta_s - mu_s * a_stage

    # Bottleneck 1x1 conv, PyTorch layout (out, in); in = S*Fo + C (concat order: stages..., feats)
    w_bot = 0.2 * jax.random.normal(keys[6], (Fo, Ctot), jnp.float32)
    g_b = 1.0 + 0.1 * jax.random.normal(keys[7], (Fo,), jnp.float32)
    beta_b = 0.1 * jax.random.normal(keys[8], (Fo,), jnp.float32)
    mu_b = 0.05 * jax.random.normal(keys[9], (Fo,), jnp.float32)
    var_b = 1.0 + 0.1 * jax.random.uniform(keys[10], (Fo,), jnp.float32)
    a_bot = g_b / jnp.sqrt(var_b + eps)
    b_bot = beta_b - mu_b * a_bot

    pt, ut, wct_cat, wft, masks, bias = build_psp_operands(
        w_stage, a_stage, b_stage, w_bot, a_bot, b_bot, sizes, H, W)

    out = jax.block_until_ready(psp_forward(feats, pt, ut, wct_cat, wft, masks, bias))
    ref = jax.block_until_ready(psp_reference(feats, w_stage, a_stage, b_stage,
                                              w_bot, a_bot, b_bot, sizes))

    assert out.shape == (N, Fo, H, W), out.shape
    # Tolerance accounts for bf16 MXU operands in the kernel vs a HIGHEST-precision
    # pure-JAX reference.  At larger C the bound should be scaled ~sqrt(C); with
    # Precision.HIGHEST + f32 operands in the kernel the max abs diff is <1e-5.
    o_np, r_np = np.asarray(out), np.asarray(ref)
    if not np.allclose(o_np, r_np, atol=2e-2, rtol=2e-2):
        raise AssertionError(
            "Pallas PSPModule output does not match JAX reference "
            f"(max abs err {np.max(np.abs(o_np - r_np)):.3e})")

    print("KERNEL_OK")
</pallas_src>

<mosaic_0001>
module attributes {stable_mosaic.version = 11 : i64} {
  func.func @psp_kernel(%arg0: i32, %arg1: i32, %arg2: memref<1x4x256xbf16, #tpu.memory_space<vmem>>, %arg3: memref<32x4xbf16, #tpu.memory_space<vmem>>, %arg4: memref<8x4xbf16, #tpu.memory_space<vmem>>, %arg5: memref<256x50xbf16, #tpu.memory_space<vmem>>, %arg6: memref<50x256xbf16, #tpu.memory_space<vmem>>, %arg7: memref<4x1x50xf32, #tpu.memory_space<vmem>>, %arg8: memref<8x1xf32, #tpu.memory_space<vmem>>, %arg9: memref<1x8x256xf32, #tpu.memory_space<vmem>>, %arg10: memref<32x50xf32, #tpu.memory_space<vmem>>, %arg11: memref<8x256xf32, #tpu.memory_space<vmem>>) attributes {dimension_semantics = [#tpu.dimension_semantics<parallel>, #tpu.dimension_semantics<arbitrary>], iteration_bounds = array<i64: 2, 1>, scalar_prefetch = 0 : i64, scratch_operands = 2 : i64, tpu.core_type = #tpu.core_type<tc>, window_params = [{transform_indices = @transform_0, window_bounds = array<i64: 1, 4, 256>}, {transform_indices = @transform_1, window_bounds = array<i64: 32, 4>}, {transform_indices = @transform_2, window_bounds = array<i64: 8, 4>}, {pipeline_mode = #tpu.pipeline_mode<synchronous>, transform_indices = @transform_3, window_bounds = array<i64: 256, 50>}, {pipeline_mode = #tpu.pipeline_mode<synchronous>, transform_indices = @transform_4, window_bounds = array<i64: 50, 256>}, {pipeline_mode = #tpu.pipeline_mode<synchronous>, transform_indices = @transform_5, window_bounds = array<i64: 4, 1, 50>}, {pipeline_mode = #tpu.pipeline_mode<synchronous>, transform_indices = @transform_6, window_bounds = array<i64: 8, 1>}, {transform_indices = @transform_7, window_bounds = array<i64: 1, 8, 256>}]} {
    %c0_i32 = arith.constant 0 : i32
    %0 = arith.cmpi eq, %arg1, %c0_i32 : i32
    %1 = arith.extui %0 : i1 to i32
    %c0_i32_0 = arith.constant 0 : i32
    %2 = arith.cmpi ne, %1, %c0_i32_0 : i32
    scf.if %2 {
      %cst_21 = arith.constant 0.000000e+00 : f32
      %21 = vector.broadcast %cst_21 : f32 to vector<32x50xf32>
      %c0_22 = arith.constant 0 : index
      %c0_23 = arith.constant 0 : index
      %22 = vector.load %arg10[%c0_22, %c0_23] : memref<32x50xf32, #tpu.memory_space<vmem>>, vector<32x50xf32>
      tpu.vector_store %arg10[%c0_22, %c0_23], %21 {strides = array<i32>} : memref<32x50xf32, #tpu.memory_space<vmem>>, vector<32x50xf32>,
      %cst_24 = arith.constant 0.000000e+00 : f32
      %23 = vector.broadcast %cst_24 : f32 to vector<8x256xf32>
      %c0_25 = arith.constant 0 : index
      %c0_26 = arith.constant 0 : index
      %24 = vector.load %arg11[%c0_25, %c0_26] : memref<8x256xf32, #tpu.memory_space<vmem>>, vector<8x256xf32>
      tpu.vector_store %arg11[%c0_25, %c0_26], %23 {strides = array<i32>} : memref<8x256xf32, #tpu.memory_space<vmem>>, vector<8x256xf32>,
    } else {
    }
    %c0 = arith.constant 0 : index
    %c0_1 = arith.constant 0 : index
    %c0_2 = arith.constant 0 : index
    %3 = vector.load %arg2[%c0, %c0_1, %c0_2] : memref<1x4x256xbf16, #tpu.memory_space<vmem>>, vector<1x4x256xbf16>
    %4 = vector.shape_cast %3 : vector<1x4x256xbf16> to vector<4x256xbf16>
    %c0_3 = arith.constant 0 : index
    %c0_4 = arith.constant 0 : index
    %5 = vector.load %arg5[%c0_3, %c0_4] : memref<256x50xbf16, #tpu.memory_space<vmem>>, vector<256x50xbf16>
    %cst = arith.constant dense<0.000000e+00> : vector<4x50xf32>
    %6 = tpu.matmul %4, %5, %cst {dimension_numbers = #tpu.dot_dimension_numbers<[1], [0], [0], [1], [0, 0, 1, 1], [], []>} : vector<4x256xbf16>, vector<256x50xbf16>, vector<4x50xf32> -> vector<4x50xf32>
    %c0_5 = arith.constant 0 : index
    %c0_6 = arith.constant 0 : index
    %7 = vector.load %arg10[%c0_5, %c0_6] : memref<32x50xf32, #tpu.memory_space<vmem>>, vector<32x50xf32>
    %c0_7 = arith.constant 0 : index
    %c0_8 = arith.constant 0 : index
    %8 = vector.load %arg3[%c0_7, %c0_8] : memref<32x4xbf16, #tpu.memory_space<vmem>>, vector<32x4xbf16>
    %9 = arith.truncf %6 : vector<4x50xf32> to vector<4x50xbf16>
    %cst_9 = arith.constant dense<0.000000e+00> : vector<32x50xf32>
    %10 = tpu.matmul %8, %9, %cst_9 {dimension_numbers = #tpu.dot_dimension_numbers<[1], [0], [0], [1], [0, 0, 1, 1], [], []>} : vector<32x4xbf16>, vector<4x50xbf16>, vector<32x50xf32> -> vector<32x50xf32>
    %11 = arith.addf %7, %10 : vector<32x50xf32>
    %c0_10 = arith.constant 0 : index
    %c0_11 = arith.constant 0 : index
    %12 = vector.load %arg10[%c0_10, %c0_11] : memref<32x50xf32, #tpu.memory_space<vmem>>, vector<32x50xf32>
    tpu.vector_store %arg10[%c0_10, %c0_11], %11 {strides = array<i32>} : memref<32x50xf32, #tpu.memory_space<vmem>>, vector<32x50xf32>,
    %c0_12 = arith.constant 0 : index
    %c0_13 = arith.constant 0 : index
    %13 = vector.load %arg11[%c0_12, %c0_13] : memref<8x256xf32, #tpu.memory_space<vmem>>, vector<8x256xf32>
    %c0_14 = arith.constant 0 : index
    %c0_15 = arith.constant 0 : index
    %14 = vector.load %arg4[%c0_14, %c0_15] : memref<8x4xbf16, #tpu.memory_space<vmem>>, vector<8x4xbf16>
    %cst_16 = arith.constant dense<0.000000e+00> : vector<8x256xf32>
    %15 = tpu.matmul %14, %4, %cst_16 {dimension_numbers = #tpu.dot_dimension_numbers<[1], [0], [0], [1], [0, 0, 1, 1], [], []>} : vector<8x4xbf16>, vector<4x256xbf16>, vector<8x256xf32> -> vector<8x256xf32>
    %16 = arith.addf %13, %15 : vector<8x256xf32>
    %c0_17 = arith.constant 0 : index
    %c0_18 = arith.constant 0 : index
    %17 = vector.load %arg11[%c0_17, %c0_18] : memref<8x256xf32, #tpu.memory_space<vmem>>, vector<8x256xf32>
    tpu.vector_store %arg11[%c0_17, %c0_18], %16 {strides = array<i32>} : memref<8x256xf32, #tpu.memory_space<vmem>>, vector<8x256xf32>,
    %c0_i32_19 = arith.constant 0 : i32
    %18 = arith.cmpi eq, %arg1, %c0_i32_19 : i32
    %19 = arith.extui %18 : i1 to i32
    %c0_i32_20 = arith.constant 0 : i32
    %20 = arith.cmpi ne, %19, %c0_i32_20 : i32
    scf.if %20 {
      %c0_21 = arith.constant 0 : index
      %c0_22 = arith.constant 0 : index
      %21 = vector.load %arg10[%c0_21, %c0_22] : memref<32x50xf32, #tpu.memory_space<vmem>>, vector<32x50xf32>
      %c0_23 = arith.constant 0 : index
      %c0_24 = arith.constant 0 : index
      %c0_25 = arith.constant 0 : index
      %22 = vector.load %arg7[%c0_23, %c0_24, %c0_25] : memref<4x1x50xf32, #tpu.memory_space<vmem>>, vector<1x1x50xf32>
      %23 = vector.shape_cast %22 : vector<1x1x50xf32> to vector<1x50xf32>
      %24 = vector.extract_strided_slice %21 {offsets = [0, 0], sizes = [8, 50], strides = [1, 1]} : vector<32x50xf32> to vector<8x50xf32>
      %25 = vector.broadcast %23 : vector<1x50xf32> to vector<8x50xf32>
      %26 = arith.mulf %25, %24 : vector<8x50xf32>
      %c1 = arith.constant 1 : index
      %c0_26 = arith.constant 0 : index
      %c0_27 = arith.constant 0 : index
      %27 = vector.load %arg7[%c1, %c0_26, %c0_27] : memref<4x1x50xf32, #tpu.memory_space<vmem>>, vector<1x1x50xf32>
      %28 = vector.shape_cast %27 : vector<1x1x50xf32> to vector<1x50xf32>
      %29 = vector.extract_strided_slice %21 {offsets = [8, 0], sizes = [8, 50], strides = [1, 1]} : vector<32x50xf32> to vector<8x50xf32>
      %30 = vector.broadcast %28 : vector<1x50xf32> to vector<8x50xf32>
      %31 = arith.mulf %30, %29 : vector<8x50xf32>
      %32 = arith.addf %26, %31 : vector<8x50xf32>
      %c2 = arith.constant 2 : index
      %c0_28 = arith.constant 0 : index
      %c0_29 = arith.constant 0 : index
      %33 = vector.load %arg7[%c2, %c0_28, %c0_29] : memref<4x1x50xf32, #tpu.memory_space<vmem>>, vector<1x1x50xf32>
      %34 = vector.shape_cast %33 : vector<1x1x50xf32> to vector<1x50xf32>
      %35 = vector.extract_strided_slice %21 {offsets = [16, 0], sizes = [8, 50], strides = [1, 1]} : vector<32x50xf32> to vector<8x50xf32>
      %36 = vector.broadcast %34 : vector<1x50xf32> to vector<8x50xf32>
      %37 = arith.mulf %36, %35 : vector<8x50xf32>
      %38 = arith.addf %32, %37 : vector<8x50xf32>
      %c3 = arith.constant 3 : index
      %c0_30 = arith.constant 0 : index
      %c0_31 = arith.constant 0 : index
      %39 = vector.load %arg7[%c3, %c0_30, %c0_31] : memref<4x1x50xf32, #tpu.memory_space<vmem>>, vector<1x1x50xf32>
      %40 = vector.shape_cast %39 : vector<1x1x50xf32> to vector<1x50xf32>
      %41 = vector.extract_strided_slice %21 {offsets = [24, 0], sizes = [8, 50], strides = [1, 1]} : vector<32x50xf32> to vector<8x50xf32>
      %42 = vector.broadcast %40 : vector<1x50xf32> to vector<8x50xf32>
      %43 = arith.mulf %42, %41 : vector<8x50xf32>
      %44 = arith.addf %38, %43 : vector<8x50xf32>
      %45 = arith.truncf %44 : vector<8x50xf32> to vector<8x50xbf16>
      %c0_32 = arith.constant 0 : index
      %c0_33 = arith.constant 0 : index
      %46 = vector.load %arg6[%c0_32, %c0_33] : memref<50x256xbf16, #tpu.memory_space<vmem>>, vector<50x256xbf16>
      %cst_34 = arith.constant dense<0.000000e+00> : vector<8x256xf32>
      %47 = tpu.matmul %45, %46, %cst_34 {dimension_numbers = #tpu.dot_dimension_numbers<[1], [0], [0], [1], [0, 0, 1, 1], [], []>} : vector<8x50xbf16>, vector<50x256xbf16>, vector<8x256xf32> -> vector<8x256xf32>
      %c0_35 = arith.constant 0 : index
      %c0_36 = arith.constant 0 : index
      %48 = vector.load %arg11[%c0_35, %c0_36] : memref<8x256xf32, #tpu.memory_space<vmem>>, vector<8x256xf32>
      %49 = arith.addf %47, %48 : vector<8x256xf32>
      %c0_37 = arith.constant 0 : index
      %c0_38 = arith.constant 0 : index
      %50 = vector.load %arg8[%c0_37, %c0_38] : memref<8x1xf32, #tpu.memory_space<vmem>>, vector<8x1xf32>
      %51 = vector.broadcast %50 : vector<8x1xf32> to vector<8x256xf32>
      %52 = arith.addf %49, %51 : vector<8x256xf32>
      %cst_39 = arith.constant 0.000000e+00 : f32
      %53 = vector.broadcast %cst_39 : f32 to vector<8x256xf32>
      %54 = arith.maximumf %52, %53 : vector<8x256xf32>
      %c0_40 = arith.constant 0 : index
      %c0_41 = arith.constant 0 : index
      %c0_42 = arith.constant 0 : index
      %55 = vector.load %arg9[%c0_40, %c0_41, %c0_42] : memref<1x8x256xf32, #tpu.memory_space<vmem>>, vector<1x8x256xf32>
      %56 = vector.shape_cast %55 : vector<1x8x256xf32> to vector<8x256xf32>
      %57 = vector.shape_cast %54 : vector<8x256xf32> to vector<1x8x256xf32>
      tpu.vector_store %arg9[%c0_40, %c0_41, %c0_42], %57 {strides = array<i32>} : memref<1x8x256xf32, #tpu.memory_space<vmem>>, vector<1x8x256xf32>,
    } else {
    }
    return
  }
  func.func @transform_0(%arg0: i32, %arg1: i32) -> (i32, i32, i32) {
    %c0_i32 = arith.constant 0 : i32
    %c0_i32_0 = arith.constant 0 : i32
    return %arg0, %arg1, %c0_i32 : i32, i32, i32
  }
  func.func @transform_1(%arg0: i32, %arg1: i32) -> (i32, i32) {
    %c0_i32 = arith.constant 0 : i32
    %c0_i32_0 = arith.constant 0 : i32
    return %c0_i32, %arg1 : i32, i32
  }
  func.func @transform_2(%arg0: i32, %arg1: i32) -> (i32, i32) {
    %c0_i32 = arith.constant 0 : i32
    %c0_i32_0 = arith.constant 0 : i32
    return %c0_i32, %arg1 : i32, i32
  }
  func.func @transform_3(%arg0: i32, %arg1: i32) -> (i32, i32) {
    %c0_i32 = arith.constant 0 : i32
    %c0_i32_0 = arith.constant 0 : i32
    %c0_i32_1 = arith.constant 0 : i32
    return %c0_i32, %c0_i32_0 : i32, i32
  }
  func.func @transform_4(%arg0: i32, %arg1: i32) -> (i32, i32) {
    %c0_i32 = arith.constant 0 : i32
    %c0_i32_0 = arith.constant 0 : i32
    %c0_i32_1 = arith.constant 0 : i32
    return %c0_i32, %c0_i32_0 : i32, i32
  }
  func.func @transform_5(%arg0: i32, %arg1: i32) -> (i32, i32, i32) {
    %c0_i32 = arith.constant 0 : i32
    %c0_i32_0 = arith.constant 0 : i32
    %c0_i32_1 = arith.constant 0 : i32
    %c0_i32_2 = arith.constant 0 : i32
    return %c0_i32, %c0_i32_0, %c0_i32_1 : i32, i32, i32
  }
  func.func @transform_6(%arg0: i32, %arg1: i32) -> (i32, i32) {
    %c0_i32 = arith.constant 0 : i32
    %c0_i32_0 = arith.constant 0 : i32
    %c0_i32_1 = arith.constant 0 : i32
    return %c0_i32, %c0_i32_0 : i32, i32
  }
  func.func @transform_7(%arg0: i32, %arg1: i32) -> (i32, i32, i32) {
    %c0_i32 = arith.constant 0 : i32
    %c0_i32_0 = arith.constant 0 : i32
    %c0_i32_1 = arith.constant 0 : i32
    return %arg0, %c0_i32, %c0_i32_0 : i32, i32, i32
  }
}

module attributes {stable_mosaic.version = 11 : i64} {
  func.func @psp_kernel(%arg0: i32, %arg1: i32, %arg2: memref<1x4x256xbf16, #tpu.memory_space<vmem>>, %arg3: memref<32x4xbf16, #tpu.memory_space<vmem>>, %arg4: memref<8x4xbf16, #tpu.memory_space<vmem>>, %arg5: memref<256x50xbf16, #tpu.memory_space<vmem>>, %arg6: memref<50x256xbf16, #tpu.memory_space<vmem>>, %arg7: memref<4x1x50xf32, #tpu.memory_space<vmem>>, %arg8: memref<8x1xf32, #tpu.memory_space<vmem>>, %arg9: memref<1x8x256xf32, #tpu.memory_space<vmem>>, %arg10: memref<32x50xf32, #tpu.memory_space<vmem>>, %arg11: memref<8x256xf32, #tpu.memory_space<vmem>>) attributes {dimension_semantics = [#tpu.dimension_semantics<parallel>, #tpu.dimension_semantics<arbitrary>], iteration_bounds = array<i64: 2, 1>, scalar_prefetch = 0 : i64, scratch_operands = 2 : i64, tpu.core_type = #tpu.core_type<tc>, window_params = [{transform_indices = @transform_0, window_bounds = array<i64: 1, 4, 256>}, {transform_indices = @transform_1, window_bounds = array<i64: 32, 4>}, {transform_indices = @transform_2, window_bounds = array<i64: 8, 4>}, {pipeline_mode = #tpu.pipeline_mode<synchronous>, transform_indices = @transform_3, window_bounds = array<i64: 256, 50>}, {pipeline_mode = #tpu.pipeline_mode<synchronous>, transform_indices = @transform_4, window_bounds = array<i64: 50, 256>}, {pipeline_mode = #tpu.pipeline_mode<synchronous>, transform_indices = @transform_5, window_bounds = array<i64: 4, 1, 50>}, {pipeline_mode = #tpu.pipeline_mode<synchronous>, transform_indices = @transform_6, window_bounds = array<i64: 8, 1>}, {transform_indices = @transform_7, window_bounds = array<i64: 1, 8, 256>}]} {
    %c0_i32 = arith.constant 0 : i32
    %0 = arith.cmpi eq, %arg1, %c0_i32 : i32
    %1 = arith.extui %0 : i1 to i32
    %c0_i32_0 = arith.constant 0 : i32
    %2 = arith.cmpi ne, %1, %c0_i32_0 : i32
    scf.if %2 {
      %cst_21 = arith.constant 0.000000e+00 : f32
      %21 = vector.broadcast %cst_21 : f32 to vector<32x50xf32>
      %c0_22 = arith.constant 0 : index
      %c0_23 = arith.constant 0 : index
      %22 = vector.load %arg10[%c0_22, %c0_23] : memref<32x50xf32, #tpu.memory_space<vmem>>, vector<32x50xf32>
      tpu.vector_store %arg10[%c0_22, %c0_23], %21 {strides = array<i32>} : memref<32x50xf32, #tpu.memory_space<vmem>>, vector<32x50xf32>,
      %cst_24 = arith.constant 0.000000e+00 : f32
      %23 = vector.broadcast %cst_24 : f32 to vector<8x256xf32>
      %c0_25 = arith.constant 0 : index
      %c0_26 = arith.constant 0 : index
      %24 = vector.load %arg11[%c0_25, %c0_26] : memref<8x256xf32, #tpu.memory_space<vmem>>, vector<8x256xf32>
      tpu.vector_store %arg11[%c0_25, %c0_26], %23 {strides = array<i32>} : memref<8x256xf32, #tpu.memory_space<vmem>>, vector<8x256xf32>,
    } else {
    }
    %c0 = arith.constant 0 : index
    %c0_1 = arith.constant 0 : index
    %c0_2 = arith.constant 0 : index
    %3 = vector.load %arg2[%c0, %c0_1, %c0_2] : memref<1x4x256xbf16, #tpu.memory_space<vmem>>, vector<1x4x256xbf16>
    %4 = vector.shape_cast %3 : vector<1x4x256xbf16> to vector<4x256xbf16>
    %c0_3 = arith.constant 0 : index
    %c0_4 = arith.constant 0 : index
    %5 = vector.load %arg5[%c0_3, %c0_4] : memref<256x50xbf16, #tpu.memory_space<vmem>>, vector<256x50xbf16>
    %cst = arith.constant dense<0.000000e+00> : vector<4x50xf32>
    %6 = tpu.matmul %4, %5, %cst {dimension_numbers = #tpu.dot_dimension_numbers<[1], [0], [0], [1], [0, 0, 1, 1], [], []>} : vector<4x256xbf16>, vector<256x50xbf16>, vector<4x50xf32> -> vector<4x50xf32>
    %c0_5 = arith.constant 0 : index
    %c0_6 = arith.constant 0 : index
    %7 = vector.load %arg10[%c0_5, %c0_6] : memref<32x50xf32, #tpu.memory_space<vmem>>, vector<32x50xf32>
    %c0_7 = arith.constant 0 : index
    %c0_8 = arith.constant 0 : index
    %8 = vector.load %arg3[%c0_7, %c0_8] : memref<32x4xbf16, #tpu.memory_space<vmem>>, vector<32x4xbf16>
    %9 = arith.truncf %6 : vector<4x50xf32> to vector<4x50xbf16>
    %cst_9 = arith.constant dense<0.000000e+00> : vector<32x50xf32>
    %10 = tpu.matmul %8, %9, %cst_9 {dimension_numbers = #tpu.dot_dimension_numbers<[1], [0], [0], [1], [0, 0, 1, 1], [], []>} : vector<32x4xbf16>, vector<4x50xbf16>, vector<32x50xf32> -> vector<32x50xf32>
    %11 = arith.addf %7, %10 : vector<32x50xf32>
    %c0_10 = arith.constant 0 : index
    %c0_11 = arith.constant 0 : index
    %12 = vector.load %arg10[%c0_10, %c0_11] : memref<32x50xf32, #tpu.memory_space<vmem>>, vector<32x50xf32>
    tpu.vector_store %arg10[%c0_10, %c0_11], %11 {strides = array<i32>} : memref<32x50xf32, #tpu.memory_space<vmem>>, vector<32x50xf32>,
    %c0_12 = arith.constant 0 : index
    %c0_13 = arith.constant 0 : index
    %13 = vector.load %arg11[%c0_12, %c0_13] : memref<8x256xf32, #tpu.memory_space<vmem>>, vector<8x256xf32>
    %c0_14 = arith.constant 0 : index
    %c0_15 = arith.constant 0 : index
    %14 = vector.load %arg4[%c0_14, %c0_15] : memref<8x4xbf16, #tpu.memory_space<vmem>>, vector<8x4xbf16>
    %cst_16 = arith.constant dense<0.000000e+00> : vector<8x256xf32>
    %15 = tpu.matmul %14, %4, %cst_16 {dimension_numbers = #tpu.dot_dimension_numbers<[1], [0], [0], [1], [0, 0, 1, 1], [], []>} : vector<8x4xbf16>, vector<4x256xbf16>, vector<8x256xf32> -> vector<8x256xf32>
    %16 = arith.addf %13, %15 : vector<8x256xf32>
    %c0_17 = arith.constant 0 : index
    %c0_18 = arith.constant 0 : index
    %17 = vector.load %arg11[%c0_17, %c0_18] : memref<8x256xf32, #tpu.memory_space<vmem>>, vector<8x256xf32>
    tpu.vector_store %arg11[%c0_17, %c0_18], %16 {strides = array<i32>} : memref<8x256xf32, #tpu.memory_space<vmem>>, vector<8x256xf32>,
    %c0_i32_19 = arith.constant 0 : i32
    %18 = arith.cmpi eq, %arg1, %c0_i32_19 : i32
    %19 = arith.extui %18 : i1 to i32
    %c0_i32_20 = arith.constant 0 : i32
    %20 = arith.cmpi ne, %19, %c0_i32_20 : i32
    scf.if %20 {
      %c0_21 = arith.constant 0 : index
      %c0_22 = arith.constant 0 : index
      %21 = vector.load %arg10[%c0_21, %c0_22] : memref<32x50xf32, #tpu.memory_space<vmem>>, vector<32x50xf32>
      %c0_23 = arith.constant 0 : index
      %c0_24 = arith.constant 0 : index
      %c0_25 = arith.constant 0 : index
      %22 = vector.load %arg7[%c0_23, %c0_24, %c0_25] : memref<4x1x50xf32, #tpu.memory_space<vmem>>, vector<1x1x50xf32>
      %23 = vector.shape_cast %22 : vector<1x1x50xf32> to vector<1x50xf32>
      %24 = vector.extract_strided_slice %21 {offsets = [0, 0], sizes = [8, 50], strides = [1, 1]} : vector<32x50xf32> to vector<8x50xf32>
      %25 = vector.broadcast %23 : vector<1x50xf32> to vector<8x50xf32>
      %26 = arith.mulf %25, %24 : vector<8x50xf32>
      %c1 = arith.constant 1 : index
      %c0_26 = arith.constant 0 : index
      %c0_27 = arith.constant 0 : index
      %27 = vector.load %arg7[%c1, %c0_26, %c0_27] : memref<4x1x50xf32, #tpu.memory_space<vmem>>, vector<1x1x50xf32>
      %28 = vector.shape_cast %27 : vector<1x1x50xf32> to vector<1x50xf32>
      %29 = vector.extract_strided_slice %21 {offsets = [8, 0], sizes = [8, 50], strides = [1, 1]} : vector<32x50xf32> to vector<8x50xf32>
      %30 = vector.broadcast %28 : vector<1x50xf32> to vector<8x50xf32>
      %31 = arith.mulf %30, %29 : vector<8x50xf32>
      %32 = arith.addf %26, %31 : vector<8x50xf32>
      %c2 = arith.constant 2 : index
      %c0_28 = arith.constant 0 : index
      %c0_29 = arith.constant 0 : index
      %33 = vector.load %arg7[%c2, %c0_28, %c0_29] : memref<4x1x50xf32, #tpu.memory_space<vmem>>, vector<1x1x50xf32>
      %34 = vector.shape_cast %33 : vector<1x1x50xf32> to vector<1x50xf32>
      %35 = vector.extract_strided_slice %21 {offsets = [16, 0], sizes = [8, 50], strides = [1, 1]} : vector<32x50xf32> to vector<8x50xf32>
      %36 = vector.broadcast %34 : vector<1x50xf32> to vector<8x50xf32>
      %37 = arith.mulf %36, %35 : vector<8x50xf32>
      %38 = arith.addf %32, %37 : vector<8x50xf32>
      %c3 = arith.constant 3 : index
      %c0_30 = arith.constant 0 : index
      %c0_31 = arith.constant 0 : index
      %39 = vector.load %arg7[%c3, %c0_30, %c0_31] : memref<4x1x50xf32, #tpu.memory_space<vmem>>, vector<1x1x50xf32>
      %40 = vector.shape_cast %39 : vector<1x1x50xf32> to vector<1x50xf32>
      %41 = vector.extract_strided_slice %21 {offsets = [24, 0], sizes = [8, 50], strides = [1, 1]} : vector<32x50xf32> to vector<8x50xf32>
      %42 = vector.broadcast %40 : vector<1x50xf32> to vector<8x50xf32>
      %43 = arith.mulf %42, %41 : vector<8x50xf32>
      %44 = arith.addf %38, %43 : vector<8x50xf32>
      %45 = arith.truncf %44 : vector<8x50xf32> to vector<8x50xbf16>
      %c0_32 = arith.constant 0 : index
      %c0_33 = arith.constant 0 : index
      %46 = vector.load %arg6[%c0_32, %c0_33] : memref<50x256xbf16, #tpu.memory_space<vmem>>, vector<50x256xbf16>
      %cst_34 = arith.constant dense<0.000000e+00> : vector<8x256xf32>
      %47 = tpu.matmul %45, %46, %cst_34 {dimension_numbers = #tpu.dot_dimension_numbers<[1], [0], [0], [1], [0, 0, 1, 1], [], []>} : vector<8x50xbf16>, vector<50x256xbf16>, vector<8x256xf32> -> vector<8x256xf32>
      %c0_35 = arith.constant 0 : index
      %c0_36 = arith.constant 0 : index
      %48 = vector.load %arg11[%c0_35, %c0_36] : memref<8x256xf32, #tpu.memory_space<vmem>>, vector<8x256xf32>
      %49 = arith.addf %47, %48 : vector<8x256xf32>
      %c0_37 = arith.constant 0 : index
      %c0_38 = arith.constant 0 : index
      %50 = vector.load %arg8[%c0_37, %c0_38] : memref<8x1xf32, #tpu.memory_space<vmem>>, vector<8x1xf32>
      %51 = vector.broadcast %50 : vector<8x1xf32> to vector<8x256xf32>
      %52 = arith.addf %49, %51 : vector<8x256xf32>
      %cst_39 = arith.constant 0.000000e+00 : f32
      %53 = vector.broadcast %cst_39 : f32 to vector<8x256xf32>
      %54 = arith.maximumf %52, %53 : vector<8x256xf32>
      %c0_40 = arith.constant 0 : index
      %c0_41 = arith.constant 0 : index
      %c0_42 = arith.constant 0 : index
      %55 = vector.load %arg9[%c0_40, %c0_41, %c0_42] : memref<1x8x256xf32, #tpu.memory_space<vmem>>, vector<1x8x256xf32>
      %56 = vector.shape_cast %55 : vector<1x8x256xf32> to vector<8x256xf32>
      %57 = vector.shape_cast %54 : vector<8x256xf32> to vector<1x8x256xf32>
      tpu.vector_store %arg9[%c0_40, %c0_41, %c0_42], %57 {strides = array<i32>} : memref<1x8x256xf32, #tpu.memory_space<vmem>>, vector<1x8x256xf32>,
    } else {
    }
    return
  }
  func.func @transform_0(%arg0: i32, %arg1: i32) -> (i32, i32, i32) {
    %c0_i32 = arith.constant 0 : i32
    %c0_i32_0 = arith.constant 0 : i32
    return %arg0, %arg1, %c0_i32 : i32, i32, i32
  }
  func.func @transform_1(%arg0: i32, %arg1: i32) -> (i32, i32) {
    %c0_i32 = arith.constant 0 : i32
    %c0_i32_0 = arith.constant 0 : i32
    return %c0_i32, %arg1 : i32, i32
  }
  func.func @transform_2(%arg0: i32, %arg1: i32) -> (i32, i32) {
    %c0_i32 = arith.constant 0 : i32
    %c0_i32_0 = arith.constant 0 : i32
    return %c0_i32, %arg1 : i32, i32
  }
  func.func @transform_3(%arg0: i32, %arg1: i32) -> (i32, i32) {
    %c0_i32 = arith.constant 0 : i32
    %c0_i32_0 = arith.constant 0 : i32
    %c0_i32_1 = arith.constant 0 : i32
    return %c0_i32, %c0_i32_0 : i32, i32
  }
  func.func @transform_4(%arg0: i32, %arg1: i32) -> (i32, i32) {
    %c0_i32 = arith.constant 0 : i32
    %c0_i32_0 = arith.constant 0 : i32
    %c0_i32_1 = arith.constant 0 : i32
    return %c0_i32, %c0_i32_0 : i32, i32
  }
  func.func @transform_5(%arg0: i32, %arg1: i32) -> (i32, i32, i32) {
    %c0_i32 = arith.constant 0 : i32
    %c0_i32_0 = arith.constant 0 : i32
    %c0_i32_1 = arith.constant 0 : i32
    %c0_i32_2 = arith.constant 0 : i32
    return %c0_i32, %c0_i32_0, %c0_i32_1 : i32, i32, i32
  }
  func.func @transform_6(%arg0: i32, %arg1: i32) -> (i32, i32) {
    %c0_i32 = arith.constant 0 : i32
    %c0_i32_0 = arith.constant 0 : i32
    %c0_i32_1 = arith.constant 0 : i32
    return %c0_i32, %c0_i32_0 : i32, i32
  }
  func.func @transform_7(%arg0: i32, %arg1: i32) -> (i32, i32, i32) {
    %c0_i32 = arith.constant 0 : i32
    %c0_i32_0 = arith.constant 0 : i32
    %c0_i32_1 = arith.constant 0 : i32
    return %arg0, %c0_i32, %c0_i32_0 : i32, i32, i32
  }
}

</mosaic_0001>

<bundles_post_ra>
// kernel: tpu_custom_call.1
= control target key start
LH: loop header
LB: loop body
LE: loop exit
PB: predicated region body
PF: predicated region fallthrough
CT: control target
= control target key end

     0   :  { %12 = vsyncpa [#allocation5], 0  ;;  %s1464_s0 = inlined_call_operand.vmem [shape: bf16[2,4,256], index: 0, kind: input, shape index: {}]   ;;  %s1465_s1 = inlined_call_operand.vmem [shape: bf16[32,4], index: 1, kind: input, shape index: {}]   ;;  %s1466_s2 = inlined_call_operand.vmem [shape: bf16[8,4], index: 2, kind: input, shape index: {}]   ;;  %s1467_s3 = inlined_call_operand.vmem [shape: bf16[256,50], index: 3, kind: input, shape index: {}]   ;;  %s1468_s4 = inlined_call_operand.vmem [shape: bf16[50,256], index: 4, kind: input, shape index: {}]   ;;  %s1469_s5 = inlined_call_operand.vmem [shape: f32[4,1,50], index: 5, kind: input, shape index: {}]   ;;  %s1470_s6 = inlined_call_operand.vmem [shape: f32[8,1], index: 6, kind: input, shape index: {}]   ;;  %s1471_s7 = inlined_call_operand.hbm [shape: f32[2,8,256], index: 7, kind: output, shape index: {}]  }
   0x1   :  { %14 = vsyncpa [#allocation5 + $0x1], 0  ;;  %s1247_s24 = smov 0   ;;  %s1249_s25 = smov 0  }
   0x2   :  { %s1251_s26 = smov 0   ;;  %s1253_s27 = smov 0  }
   0x3   :  { %s1255_s28 = smov 0   ;;  %s1257_s29 = smov 0  }
   0x4 LB: > { %s948_s30 = sadd.s32 4294967295, %s1202_s29   ;;  %s949_s8 = sadd.s32 4294967294, %s1202_s29   ;;  %s1202_s29 = sphi %s1257_s29, %s20_s29   ;;  %s1198_s28 = sphi %s1255_s28, %s1478_s28   ;;  %s1194_s27 = sphi %s1253_s27, %s1477_s27   ;;  %s1190_s26 = sphi %s1251_s26, %s1476_s26   ;;  %s1186_s25 = sphi %s1249_s25, %s1475_s25   ;;  %s1182_s24 = sphi %s1247_s24, %s1474_s24  }
   0x5   : > { %s32_s9 = sadd.s32 1, %s1198_s28  ;;  %s203_s10 = sadd.s32 1, %s1190_s26 }
   0x6   : > { %p34_p0 = scmp.ge.s32.totalorder %s32_s9, 2  ;;  %p213_p1 = scmp.ne.s32.totalorder %s1190_s26, %s1186_s25 }
   0x7   : > { %p214_p2 = scmp.eq.s32.totalorder %s948_s30, 1  ;;  %p219_p3 = scmp.ne.s32.totalorder %s1186_s25, %s1182_s24 }
   0x8   : > { %s1480_s9 = smov (%p34_p0, %s32_s9), 0  ;;  %p220_p5 = scmp.eq.s32.totalorder %s949_s8, 1 }
   0x9   : > { %p1287_p4 = por %p214_p2, %p213_p1  ;;  %s200_s12 = ssub.s32 %s1198_s28, %s1480_s9 }
   0xa   : > { %p954_p6 = scmp.ge.s32.totalorder %s1202_s29, 1  ;;  %p201_p7 = scmp.eq.s32.totalorder %s200_s12, 0 }
   0xb   : > { %p1294_p8 = por %p220_p5, %p219_p3  ;;  %p276_p9 = scmp.lt.s32.totalorder %s1202_s29, 3 }
   0xc   : > { %s1300_s14 = scalar_select %p201_p7, %s1190_s26, %s203_s10  }
   0xd   : > { %p277_p10 = pnand %p954_p6, %p276_p9 }
   0xe   : > { %v1095_v0 = vld [vmem:[%s1467_s3 + $0x40] sm:$0xff] (!%p277_p10)   ;;  %v1097_v2 = vld [vmem:[%s1467_s3 + $0x48] sm:$0xff] (!%p277_p10)   ;;  %p320_p11 = scmp.lt.s32.totalorder (!%p277_p10), %s1194_s27, 1  ;;  %v1099_v4 = vld [vmem:[%s1467_s3 + $0x50] sm:$0xff] (!%p277_p10)   ;;  %vm548_vm0 = vcmask (!%p277_p10), 31744   ;;  %vm342_vm1 = vcmask (!%p277_p10), 408576  }
   0xf   : > { %280 = sbr.rel (%p277_p10) target bundleno = 736 (0x2e0), region = 48  ;;  %v1096_v1 = vld [vmem:[%s1467_s3] sm:$0xff] (!%p277_p10)   ;;  %1005 = vmatprep.subr.bf16.mxu0 (!%p277_p10), %v1095_v0  ;;  %v1098_v3 = vld [vmem:[%s1467_s3 + $0x8] sm:$0xff] (!%p277_p10)   ;;  %v1100_v5 = vld [vmem:[%s1467_s3 + $0x10] sm:$0xff] (!%p277_p10)   ;;  %v1204_v19 = vmov (!%p277_p10), 0.0   ;;  %vm555_vm2 = vcmask (!%p277_p10), 1041408  }
  0x10   : > { %1006 = vmatpush3.bf16.msra.mxu0 (!%p277_p10), %v1096_v1  ;;  %v1101_v6 = vld [vmem:[%s1467_s3 + $0x58] sm:$0xff] (!%p277_p10)   ;;  %v1103_v8 = vld [vmem:[%s1467_s3 + $0x60] sm:$0xff] (!%p277_p10)   ;;  %v1105_v10 = vld [vmem:[%s1467_s3 + $0x68] sm:$0xff] (!%p277_p10)   ;;  %345 = vst.msk [vmem:[#allocation2 + $0x10] sm:$0xff] (!%p277_p10), %vm342_vm1, %v1204_v19  ;;  %v1205_v29 = vmov (!%p277_p10), 0   ;;  %vm767_vm3 = vcmask (!%p277_p10), 1040384  }
  0x11   : > { %1007 = vmatprep.subr.bf16.mxu0 (!%p277_p10), %v1097_v2  ;;  %v1102_v7 = vld [vmem:[%s1467_s3 + $0x18] sm:$0xff] (!%p277_p10)   ;;  %v1104_v9 = vld [vmem:[%s1467_s3 + $0x20] sm:$0xff] (!%p277_p10)   ;;  %v1106_v12 = vld [vmem:[%s1467_s3 + $0x28] sm:$0xff] (!%p277_p10)   ;;  %343 = vst.msk [vmem:[#allocation2] sm:$0xff] (!%p277_p10), %vm342_vm1, %v1204_v19  ;;  %1094 = vset.pattern.permute.xlu0 (!%p277_p10), %v1205_v29  ;;  %s317_s18 = sand.u32 (!%p277_p10), 1, %s1186_s25   ;;  %s1004_s19 = sshll.u32 (!%p277_p10), %s1194_s27, 8 }
  0x12   : > { %v1107_v14 = vld [vmem:[%s1467_s3 + $0x70] sm:$0xff] (!%p277_p10)   ;;  %v1109_v16 = vld [vmem:[%s1467_s3 + $0x78] sm:$0xff] (!%p277_p10)   ;;  %v1111_v18 = vld [vmem:[%s1465_s1] sm:$0xff] (!%p277_p10)   ;;  %344 = vst.msk [vmem:[#allocation2 + $0x8] sm:$0xff] (!%p277_p10), %vm342_vm1, %v1204_v19  ;;  %s828_s10 = scalar_lea.sflag (!%p277_p10), [#allocation5], %s317_s18 }
  0x13   : > { %v1108_v15 = vld [vmem:[%s1467_s3 + $0x30] sm:$0xff] (!%p277_p10)   ;;  %v1110_v17 = vld [vmem:[%s1467_s3 + $0x38] sm:$0xff] (!%p277_p10)   ;;  %1032 = vmatprep.mubr.msk.bf16.mxu1 (!%p277_p10), %vm548_vm0, %v1111_v18  ;;  %346 = vst.msk [vmem:[#allocation2 + $0x18] sm:$0xff] (!%p277_p10), %vm342_vm1, %v1204_v19  ;;  %v1112_v27 = vld [vmem:[%s1465_s1 + $0x8] sm:$0xff] (!%p277_p10)  }
  0x14   : > { %1008 = vmatpush3.bf16.msra.mxu0 (!%p277_p10), %v1098_v3  ;;  %v619_v30 = vld [vmem:[%s1466_s2] sm:$0xf] (!%p277_p10)  ;;  %v1115_v32 = vld [vmem:[%s1468_s4 + $0x4] ss:$8 sps:$4 sm:$0xff] (!%p277_p10)   ;;  %v1118_v33 = vld [vmem:[%s1468_s4 + $0x14] ss:$8 sps:$4 sm:$0xff] (!%p277_p10)  }
  0x15   : > { %1009 = vmatprep.subr.bf16.mxu0 (!%p277_p10), %v1099_v4  ;;  %v1113_v31 = vld [vmem:[%s1468_s4] ss:$8 sps:$4 sm:$0xff] (!%p277_p10)   ;;  %v1116_v34 = vld [vmem:[%s1468_s4 + $0x10] ss:$8 sps:$4 sm:$0xff] (!%p277_p10)   ;;  %v1121_v35 = vld [vmem:[%s1468_s4 + $0x24] ss:$8 sps:$4 sm:$0xff] (!%p277_p10)  }
  0x16   : > { %s321_s8 = scalar_select %p320_p11, %s1194_s27, 1  ;;  %v726_v36 = vld [vmem:[%s1468_s4 + $0x30] sm:$0x11]  ;;  %v1119_v37 = vld [vmem:[%s1468_s4 + $0x20] ss:$8 sps:$4 sm:$0xff]  }
  0x17   : > { %v995_v38 = vcombine.high %v726_v36, %v726_v36  ;;  %v994_v39 = vcombine.low %v726_v36, %v726_v36  ;;  %v815_v41 = vld [vmem:[%s1470_s6] sm:$0xff]  ;;  %v531_v42 = vld [vmem:[#allocation2 + $0x10] sm:$0xff]  ;;  %s1206_s27 = smov [#allocation4]  }
  0x18   : > { %s1003_s17 = sshll.u32 %s321_s8, 2  ;;  %1010 = vmatpush3.bf16.msra.mxu0 %v1100_v5  ;;  %818 = vperm.xlu0 %1094, %v815_v41   ;;  %v529_v43 = vld [vmem:[#allocation2] sm:$0xff]  ;;  %s1128_s8 = sshll.u32 %s1206_s27, 4  ;;  %s1129_s8 = int_to_ptr.vmem [resolvable:$false] %s1128_s8 }
  0x19   : > { %1011 = vmatprep.subr.bf16.mxu0 %v1101_v6  ;;  %s328_s30 = scalar_lea.vmem %s1464_s0, %s1003_s17  ;;  %v769_v40 = vsel %vm767_vm3, %v994_v39, 0  ;;  %v530_v48 = vld [vmem:[#allocation2 + $0x8] sm:$0xff]  ;;  %v981_v55 = vld [vmem:[%s1469_s5] ss:$0 sm:$0xff]  ;;  %v983_v56 = vld [vmem:[%s1469_s5 + $0x1] ss:$0 sm:$0xff] }
  0x1a   : > { %v958_v11 = vld.sshfl [vmem:[%s328_s30] sm:$0x33 pattern:$0x76325410]  ;;  %v532_v45 = vld [vmem:[#allocation2 + $0x18] sm:$0xff]  ;;  %s955_s17 = sshll.u32 %s317_s18, 4  ;;  %s1417_s30 = scalar_lea.hbm %s1471_s7, %s1004_s19 }
  0x1b   : > { %v390_v13 = vcombine.high %v958_v11, %v958_v11  ;;  %v624_v28 = vsel %vm555_vm2, %v958_v11, 0  ;;  %v985_v59 = vld [vmem:[%s1469_s5 + $0x2] ss:$0 sm:$0xff]  ;;  %v987_v63 = vld [vmem:[%s1469_s5 + $0x3] ss:$0 sm:$0xff]  ;;  %s319_s20 = scalar_lea.vmem [#allocation4], %s955_s17 }
  0x1c   : > { %1012 = vmatpush3.bf16.msra.mxu0 %v1102_v7  ;;  %s842_s21 = sshll.u32 %s319_s20, 4  ;;  %s1130_s15 = scalar_lea.vmem %s1129_s8, 512  ;;  %s1419_s21 = int_to_ptr.vmem [resolvable:$true] %s842_s21 }
  0x1d   : > { %1013 = vmatprep.subr.bf16.mxu0 %v1103_v8  ;;  %521 = vmatprep.mubr.bf16.mxu0 %v390_v13  ;;  %s1124_s12 = scalar_lea.vmem %s1419_s21, 256  ;;  %p1131_p1 = scmp.lt.s32.totalorder %s1419_s21, %s1129_s8 }
  0x1e   : > { %p1125_p12 = scmp.ne.s32.totalorder %s1419_s21, %s1124_s12  ;;  %p1132_p2 = scmp.lt.s32.totalorder %s1130_s15, %s1124_s12 }
  0x20   : > { %1014 = vmatpush3.bf16.msra.mxu0 %v1104_v9  ;;  %p1126_p13 = pnand %p1125_p12, %p1287_p4  ;;  %p1133_p3 = por %p1132_p2, %p1131_p1 }
  0x21   : > { %1015 = vmatprep.subr.bf16.mxu0 %v1105_v10 }
  0x22   : > { %p1127_p0 = pneg %p1126_p13 }
  0x24   : > { %1016 = vmatpush3.bf16.msra.mxu0 %v1106_v12  ;;  %p1134_p5 = pnand %p1133_p3, %p1127_p0 }
  0x25   : > { %1017 = vmatprep.subr.bf16.mxu0 %v1107_v14 }
  0x28   : > { %1018 = vmatpush3.bf16.msra.mxu0 %v1108_v15 }
  0x29   : > { %1019 = vmatprep.subr.bf16.mxu0 %v1109_v16 }
  0x2c   : > { %1020 = vmatpush3.bf16.msra.mxu0 %v1110_v17 }
  0x2f   : > { %522 = vmatmul.mubr.bf16.vlgmr.msra.gmra.mrb[0].mxu0 %v958_v11 }
  0x97   : > { %v819_v11 = vpop.permute.xlu0 %818 }
 0x102   : > { %v1021_v20 = vpop.f32.mrb[0].mxu0 }
 0x103   : > { %v1022_v21 = vpop.f32.mrb[1].mxu0 }
 0x104   : > { %v1023_v22 = vadd.f32 %v1022_v21, %v1021_v20  ;;  %v1024_v23 = vpop.f32.mrb[2].mxu0 }
 0x105   : > { %v1025_v24 = vpop.f32.mrb[3].mxu0 }
 0x106   : > { %v537_v25 = vpack.c.bf16 %v1023_v22, %v1023_v22 }
 0x108   : > { %1036 = vmatprep.subr.msk.bf16.mxu1 %vm555_vm2, %v537_v25  ;;  %v557_v26 = vsel %vm555_vm2, %v537_v25, 0 }
 0x109   : > { %1031 = vmatpush3.bf16.msra.mxu1 %v557_v26 }
 0x10a   : > { %979 = vmatprep.subr.msk.bf16.mxu1 %vm555_vm2, %v390_v13 }
 0x10c   : > { %1033 = vmatmul.mubr.msk.bf16.vlgmr.msra.gmra.mrb[0].mxu1 %vm548_vm0, %v1112_v27 }
 0x10d   : > { %630 = vmatpush1.bf16.msra.mxu1 %v624_v28  ;;  %661 = vmatprep.mubr.bf16.mxu1 %v1205_v29 }
 0x10e   : > { %774 = vmatprep.subr.bf16.mxu1 %v1115_v32 }
 0x114   : > { %980 = vmatmul.mubr.msk.bf16.vlgmr.msra.gmra.mrb[4].mxu1 %vm548_vm0, %v619_v30 }
 0x115   : > { %806 = vmatprep.mubr.bf16.mxu1 %v1205_v29  ;;  %775 = vmatpush1.bf16.msra.mxu1 %v1113_v31 }
 0x116   : > { %776 = vmatprep.subr.bf16.mxu1 %v1118_v33 }
 0x119   : > { %777 = vmatpush1.bf16.msra.mxu1 %v1116_v34 }
 0x11a   : > { %778 = vmatprep.subr.bf16.mxu1 %v1121_v35 }
 0x11d   : > { %779 = vmatpush1.bf16.msra.mxu1 %v1119_v37 }
 0x11e   : > { %996 = vmatprep.subr.msk.bf16.mxu1 %vm767_vm3, %v995_v38 }
 0x121   : > { %781 = vmatpush1.bf16.msra.mxu1 %v769_v40 }
 0x1df   : > { %v1034_v44 = vpop.f32.mrb[0].mxu1 }
 0x1e0   : > { %v610_v46 = vadd.f32 %v1034_v44, %v531_v42  ;;  %v593_v47 = vpop.f32.mrb[1].mxu1 }
 0x1e1   : > { %v608_v49 = vadd.f32 %v593_v47, %v529_v43  ;;  %v1035_v50 = vpop.f32.mrb[2].mxu1 }
 0x1e2   : > { %615 = vst.msk [vmem:[#allocation2 + $0x10] sm:$0xff] %vm342_vm1, %v610_v46  ;;  %v611_v51 = vadd.f32 %v1035_v50, %v532_v45  ;;  %v596_v52 = vpop.f32.mrb[3].mxu1 }
 0x1e3   : > { %613 = vst.msk [vmem:[#allocation2] sm:$0xff] %vm342_vm1, %v608_v49  ;;  %v609_v53 = vadd.f32 %v596_v52, %v530_v48 }
 0x1e4   : > { %616 = vst.msk [vmem:[#allocation2 + $0x18] sm:$0xff] %vm342_vm1, %v611_v51 }
 0x1e5   : > { %614 = vst.msk [vmem:[#allocation2 + $0x8] sm:$0xff] %vm342_vm1, %v609_v53 }
 0x1e7   : > { %v663_v6 = vpop.f32.mrb[4].mxu1 }
 0x1e8   : > { %v665_v7 = vpop.f32.mrb[5].mxu1 }
 0x1e9   : > { %v679_v58 = vld [vmem:[#allocation2 + $0x10] sm:$0xff]  ;;  %v667_v8 = vpop.f32.mrb[6].mxu1 }
 0x1ea   : > { %v677_v54 = vld [vmem:[#allocation2] sm:$0xff]  ;;  %v707_v1 = vmul.f32 %v985_v59, %v679_v58  ;;  %v668_v9 = vpop.f32.mrb[7].mxu1 }
 0x1eb   : > { %v688_v60 = vmul.f32 %v981_v55, %v677_v54  ;;  %v680_v62 = vld [vmem:[#allocation2 + $0x18] sm:$0xff] }
 0x1ec   : > { %v678_v57 = vld [vmem:[#allocation2 + $0x8] sm:$0xff]  ;;  %v717_v3 = vmul.f32 %v987_v63, %v680_v62 }
 0x1ed   : > { %v697_v61 = vmul.f32 %v983_v56, %v678_v57 }
 0x1ef   : > { %v698_v0 = vadd.f32 %v697_v61, %v688_v60 }
 0x1f1   : > { %v708_v2 = vadd.f32 %v707_v1, %v698_v0 }
 0x1f3   : > { %v718_v4 = vadd.f32 %v717_v3, %v708_v2 }
 0x1f5   : > { %v719_v5 = vpack.c.bf16 %v718_v4, %v718_v4 }
 0x1f7   : > { %997 = vmatmul.mubr.msk.bf16.vlgmr.msra.gmra.mrb[8].mxu1 %vm342_vm1, %v719_v5 }
 0x2ca   : > { %v808_v10 = vpop.f32.mrb[8].mxu1 }
 0x2cb   : > { %v809_v12 = vadd.f32 %v808_v10, %v663_v6  ;;  %v810_v13 = vpop.f32.mrb[9].mxu1 }
 0x2cc   : > { %v811_v14 = vadd.f32 %v810_v13, %v665_v7  ;;  %v812_v15 = vpop.f32.mrb[10].mxu1 }
 0x2cd   : > { %v821_v16 = vadd.f32 %v819_v11, %v809_v12  ;;  %v813_v17 = vpop.f32.mrb[11].mxu1 }
 0x2ce   : > { %v822_v18 = vadd.f32 %v819_v11, %v811_v14 }
 0x2cf   : > { %v823_v19 = vmax.f32 %v821_v16, 0.0 }
 0x2d0   : > { %v824_v20 = vmax.f32 %v822_v18, 0.0 }
 0x2d1   : > { %825 = vst [vmem:[%s319_s20] sm:$0xff] %v823_v19 }
 0x2d2   : > { %826 = vst [vmem:[%s319_s20 + $0x8] sm:$0xff] %v824_v20 }
 0x2d3   : > { %1137 = shalt.err (!%p1134_p5)
}
 0x2d4   : > { %s1138_s16 = scalar_lea.hbm %s1417_s30, 256  ;;  %s1142_s19 = scalar_lea.hbm %s1471_s7, 512 }
 0x2d5   : > { %p1139_p6 = scmp.ne.s32.totalorder %s1417_s30, %s1138_s16  ;;  %p1143_p10 = scmp.lt.u32.totalorder %s1417_s30, %s1471_s7 }
 0x2d6   : > { %p1144_p11 = scmp.lt.u32.totalorder %s1142_s19, %s1138_s16  ;;  %p1146_p13 = scmp.lt.u32.totalorder %s1138_s16, %s1417_s30 }
 0x2d7   : > { %p1140_p7 = pnand %p1139_p6, %p1287_p4 }
 0x2d8   : > { %p1145_p12 = por %p1144_p11, %p1143_p10 }
 0x2d9   : > { %p1141_p9 = pneg %p1140_p7 }
 0x2da   : > { %p1147_p0 = por %p1146_p13, %p1145_p12 }
 0x2dc   : > { %p1148_p1 = pnand %p1147_p0, %p1141_p9 }
 0x2de   : > { %1151 = shalt.err (!%p1148_p1)
}
 0x2df   : > { %1037 = dma.vmem_to_hbm [thread:$0]  (%p1287_p4), %s1419_s21, 256, %s1417_s30, %s828_s10  }
 0x2e0 PF: > { %p1043_p2 = scmp.ge.s32.totalorder %s1202_s29, 2  ;;  %s854_s23 = sand.u32 1, %s1182_s24  }
 0x2e1   : > { %s855_s12 = scalar_lea.sflag [#allocation5], %s854_s23 }
 0x2e2   : > { %p1040_p3 = pnand %p1043_p2, %p1294_p8 }
 0x2e4   : > { %1177 = dma.done.wait (!%p1040_p3), %s855_s12, 256  }
 0x2e5   : > { %1179 = vsyncadd (!%p1040_p3), %s855_s12, 4294967040  ;;  %s20_s29 = sadd.s32 1, %s1202_s29   ;;  %s1474_s24 = smov %s1186_s25 }
 0x2e6   : > { %p17_p5 = scmp.ge.s32.totalorder %s20_s29, 4   ;;  %s1475_s25 = smov %s1190_s26 }
 0x2e7   : > { %s1476_s26 = smov %s1300_s14  ;;  %s1477_s27 = smov %s1198_s28 }
 0x2e8   : > { %s1478_s28 = smov %s1480_s9  ;;  %19 = sbr.rel (!%p17_p5) target bundleno = 4 (0x4), region = 100 }
 0x2ef   :  { %860 = vsyncpa [#allocation5], 1 }
 0x2f0   :  { %862 = vsyncpa [#allocation5 + $0x1], 1 }

// kernel: tpu_custom_call.1
= control target key start
LH: loop header
LB: loop body
LE: loop exit
PB: predicated region body
PF: predicated region fallthrough
CT: control target
= control target key end

     0   :  { %12 = vsyncpa [#allocation5], 0  ;;  %s1464_s0 = inlined_call_operand.vmem [shape: bf16[2,4,256], index: 0, kind: input, shape index: {}]   ;;  %s1465_s1 = inlined_call_operand.vmem [shape: bf16[32,4], index: 1, kind: input, shape index: {}]   ;;  %s1466_s2 = inlined_call_operand.vmem [shape: bf16[8,4], index: 2, kind: input, shape index: {}]   ;;  %s1467_s3 = inlined_call_operand.vmem [shape: bf16[256,50], index: 3, kind: input, shape index: {}]   ;;  %s1468_s4 = inlined_call_operand.vmem [shape: bf16[50,256], index: 4, kind: input, shape index: {}]   ;;  %s1469_s5 = inlined_call_operand.vmem [shape: f32[4,1,50], index: 5, kind: input, shape index: {}]   ;;  %s1470_s6 = inlined_call_operand.vmem [shape: f32[8,1], index: 6, kind: input, shape index: {}]   ;;  %s1471_s7 = inlined_call_operand.hbm [shape: f32[2,8,256], index: 7, kind: output, shape index: {}]  }
   0x1   :  { %14 = vsyncpa [#allocation5 + $0x1], 0  ;;  %s1247_s24 = smov 0   ;;  %s1249_s25 = smov 0  }
   0x2   :  { %s1251_s26 = smov 0   ;;  %s1253_s27 = smov 0  }
   0x3   :  { %s1255_s28 = smov 0   ;;  %s1257_s29 = smov 0  }
   0x4 LB: > { %s948_s30 = sadd.s32 4294967295, %s1202_s29   ;;  %s949_s8 = sadd.s32 4294967294, %s1202_s29   ;;  %s1202_s29 = sphi %s1257_s29, %s20_s29   ;;  %s1198_s28 = sphi %s1255_s28, %s1478_s28   ;;  %s1194_s27 = sphi %s1253_s27, %s1477_s27   ;;  %s1190_s26 = sphi %s1251_s26, %s1476_s26   ;;  %s1186_s25 = sphi %s1249_s25, %s1475_s25   ;;  %s1182_s24 = sphi %s1247_s24, %s1474_s24  }
   0x5   : > { %s32_s9 = sadd.s32 1, %s1198_s28  ;;  %s203_s10 = sadd.s32 1, %s1190_s26 }
   0x6   : > { %p34_p0 = scmp.ge.s32.totalorder %s32_s9, 2  ;;  %p213_p1 = scmp.ne.s32.totalorder %s1190_s26, %s1186_s25 }
   0x7   : > { %p214_p2 = scmp.eq.s32.totalorder %s948_s30, 1  ;;  %p219_p3 = scmp.ne.s32.totalorder %s1186_s25, %s1182_s24 }
   0x8   : > { %s1480_s9 = smov (%p34_p0, %s32_s9), 0  ;;  %p220_p5 = scmp.eq.s32.totalorder %s949_s8, 1 }
   0x9   : > { %p1287_p4 = por %p214_p2, %p213_p1  ;;  %s200_s12 = ssub.s32 %s1198_s28, %s1480_s9 }
   0xa   : > { %p954_p6 = scmp.ge.s32.totalorder %s1202_s29, 1  ;;  %p201_p7 = scmp.eq.s32.totalorder %s200_s12, 0 }
   0xb   : > { %p1294_p8 = por %p220_p5, %p219_p3  ;;  %p276_p9 = scmp.lt.s32.totalorder %s1202_s29, 3 }
   0xc   : > { %s1300_s14 = scalar_select %p201_p7, %s1190_s26, %s203_s10  }
   0xd   : > { %p277_p10 = pnand %p954_p6, %p276_p9 }
   0xe   : > { %v1095_v0 = vld [vmem:[%s1467_s3 + $0x40] sm:$0xff] (!%p277_p10)   ;;  %v1097_v2 = vld [vmem:[%s1467_s3 + $0x48] sm:$0xff] (!%p277_p10)   ;;  %p320_p11 = scmp.lt.s32.totalorder (!%p277_p10), %s1194_s27, 1  ;;  %v1099_v4 = vld [vmem:[%s1467_s3 + $0x50] sm:$0xff] (!%p277_p10)   ;;  %vm548_vm0 = vcmask (!%p277_p10), 31744   ;;  %vm342_vm1 = vcmask (!%p277_p10), 408576  }
   0xf   : > { %280 = sbr.rel (%p277_p10) target bundleno = 736 (0x2e0), region = 48  ;;  %v1096_v1 = vld [vmem:[%s1467_s3] sm:$0xff] (!%p277_p10)   ;;  %1005 = vmatprep.subr.bf16.mxu0 (!%p277_p10), %v1095_v0  ;;  %v1098_v3 = vld [vmem:[%s1467_s3 + $0x8] sm:$0xff] (!%p277_p10)   ;;  %v1100_v5 = vld [vmem:[%s1467_s3 + $0x10] sm:$0xff] (!%p277_p10)   ;;  %v1204_v19 = vmov (!%p277_p10), 0.0   ;;  %vm555_vm2 = vcmask (!%p277_p10), 1041408  }
  0x10   : > { %1006 = vmatpush3.bf16.msra.mxu0 (!%p277_p10), %v1096_v1  ;;  %v1101_v6 = vld [vmem:[%s1467_s3 + $0x58] sm:$0xff] (!%p277_p10)   ;;  %v1103_v8 = vld [vmem:[%s1467_s3 + $0x60] sm:$0xff] (!%p277_p10)   ;;  %v1105_v10 = vld [vmem:[%s1467_s3 + $0x68] sm:$0xff] (!%p277_p10)   ;;  %345 = vst.msk [vmem:[#allocation2 + $0x10] sm:$0xff] (!%p277_p10), %vm342_vm1, %v1204_v19  ;;  %v1205_v29 = vmov (!%p277_p10), 0   ;;  %vm767_vm3 = vcmask (!%p277_p10), 1040384  }
  0x11   : > { %1007 = vmatprep.subr.bf16.mxu0 (!%p277_p10), %v1097_v2  ;;  %v1102_v7 = vld [vmem:[%s1467_s3 + $0x18] sm:$0xff] (!%p277_p10)   ;;  %v1104_v9 = vld [vmem:[%s1467_s3 + $0x20] sm:$0xff] (!%p277_p10)   ;;  %v1106_v12 = vld [vmem:[%s1467_s3 + $0x28] sm:$0xff] (!%p277_p10)   ;;  %343 = vst.msk [vmem:[#allocation2] sm:$0xff] (!%p277_p10), %vm342_vm1, %v1204_v19  ;;  %1094 = vset.pattern.permute.xlu0 (!%p277_p10), %v1205_v29  ;;  %s317_s18 = sand.u32 (!%p277_p10), 1, %s1186_s25   ;;  %s1004_s19 = sshll.u32 (!%p277_p10), %s1194_s27, 8 }
  0x12   : > { %v1107_v14 = vld [vmem:[%s1467_s3 + $0x70] sm:$0xff] (!%p277_p10)   ;;  %v1109_v16 = vld [vmem:[%s1467_s3 + $0x78] sm:$0xff] (!%p277_p10)   ;;  %v1111_v18 = vld [vmem:[%s1465_s1] sm:$0xff] (!%p277_p10)   ;;  %344 = vst.msk [vmem:[#allocation2 + $0x8] sm:$0xff] (!%p277_p10), %vm342_vm1, %v1204_v19  ;;  %s828_s10 = scalar_lea.sflag (!%p277_p10), [#allocation5], %s317_s18 }
  0x13   : > { %v1108_v15 = vld [vmem:[%s1467_s3 + $0x30] sm:$0xff] (!%p277_p10)   ;;  %v1110_v17 = vld [vmem:[%s1467_s3 + $0x38] sm:$0xff] (!%p277_p10)   ;;  %1032 = vmatprep.mubr.msk.bf16.mxu1 (!%p277_p10), %vm548_vm0, %v1111_v18  ;;  %346 = vst.msk [vmem:[#allocation2 + $0x18] sm:$0xff] (!%p277_p10), %vm342_vm1, %v1204_v19  ;;  %v1112_v27 = vld [vmem:[%s1465_s1 + $0x8] sm:$0xff] (!%p277_p10)  }
  0x14   : > { %1008 = vmatpush3.bf16.msra.mxu0 (!%p277_p10), %v1098_v3  ;;  %v619_v30 = vld [vmem:[%s1466_s2] sm:$0xf] (!%p277_p10)  ;;  %v1115_v32 = vld [vmem:[%s1468_s4 + $0x4] ss:$8 sps:$4 sm:$0xff] (!%p277_p10)   ;;  %v1118_v33 = vld [vmem:[%s1468_s4 + $0x14] ss:$8 sps:$4 sm:$0xff] (!%p277_p10)  }
  0x15   : > { %1009 = vmatprep.subr.bf16.mxu0 (!%p277_p10), %v1099_v4  ;;  %v1113_v31 = vld [vmem:[%s1468_s4] ss:$8 sps:$4 sm:$0xff] (!%p277_p10)   ;;  %v1116_v34 = vld [vmem:[%s1468_s4 + $0x10] ss:$8 sps:$4 sm:$0xff] (!%p277_p10)   ;;  %v1121_v35 = vld [vmem:[%s1468_s4 + $0x24] ss:$8 sps:$4 sm:$0xff] (!%p277_p10)  }
  0x16   : > { %s321_s8 = scalar_select %p320_p11, %s1194_s27, 1  ;;  %v726_v36 = vld [vmem:[%s1468_s4 + $0x30] sm:$0x11]  ;;  %v1119_v37 = vld [vmem:[%s1468_s4 + $0x20] ss:$8 sps:$4 sm:$0xff]  }
  0x17   : > { %v995_v38 = vcombine.high %v726_v36, %v726_v36  ;;  %v994_v39 = vcombine.low %v726_v36, %v726_v36  ;;  %v815_v41 = vld [vmem:[%s1470_s6] sm:$0xff]  ;;  %v531_v42 = vld [vmem:[#allocation2 + $0x10] sm:$0xff]  ;;  %s1206_s27 = smov [#allocation4]  }
  0x18   : > { %s1003_s17 = sshll.u32 %s321_s8, 2  ;;  %1010 = vmatpush3.bf16.msra.mxu0 %v1100_v5  ;;  %818 = vperm.xlu0 %1094, %v815_v41   ;;  %v529_v43 = vld [vmem:[#allocation2] sm:$0xff]  ;;  %s1128_s8 = sshll.u32 %s1206_s27, 4  ;;  %s1129_s8 = int_to_ptr.vmem [resolvable:$false] %s1128_s8 }
  0x19   : > { %1011 = vmatprep.subr.bf16.mxu0 %v1101_v6  ;;  %s328_s30 = scalar_lea.vmem %s1464_s0, %s1003_s17  ;;  %v769_v40 = vsel %vm767_vm3, %v994_v39, 0  ;;  %v530_v48 = vld [vmem:[#allocation2 + $0x8] sm:$0xff]  ;;  %v981_v55 = vld [vmem:[%s1469_s5] ss:$0 sm:$0xff]  ;;  %v983_v56 = vld [vmem:[%s1469_s5 + $0x1] ss:$0 sm:$0xff] }
  0x1a   : > { %v958_v11 = vld.sshfl [vmem:[%s328_s30] sm:$0x33 pattern:$0x76325410]  ;;  %v532_v45 = vld [vmem:[#allocation2 + $0x18] sm:$0xff]  ;;  %s955_s17 = sshll.u32 %s317_s18, 4  ;;  %s1417_s30 = scalar_lea.hbm %s1471_s7, %s1004_s19 }
  0x1b   : > { %v390_v13 = vcombine.high %v958_v11, %v958_v11  ;;  %v624_v28 = vsel %vm555_vm2, %v958_v11, 0  ;;  %v985_v59 = vld [vmem:[%s1469_s5 + $0x2] ss:$0 sm:$0xff]  ;;  %v987_v63 = vld [vmem:[%s1469_s5 + $0x3] ss:$0 sm:$0xff]  ;;  %s319_s20 = scalar_lea.vmem [#allocation4], %s955_s17 }
  0x1c   : > { %1012 = vmatpush3.bf16.msra.mxu0 %v1102_v7  ;;  %s842_s21 = sshll.u32 %s319_s20, 4  ;;  %s1130_s15 = scalar_lea.vmem %s1129_s8, 512  ;;  %s1419_s21 = int_to_ptr.vmem [resolvable:$true] %s842_s21 }
  0x1d   : > { %1013 = vmatprep.subr.bf16.mxu0 %v1103_v8  ;;  %521 = vmatprep.mubr.bf16.mxu0 %v390_v13  ;;  %s1124_s12 = scalar_lea.vmem %s1419_s21, 256  ;;  %p1131_p1 = scmp.lt.s32.totalorder %s1419_s21, %s1129_s8 }
  0x1e   : > { %p1125_p12 = scmp.ne.s32.totalorder %s1419_s21, %s1124_s12  ;;  %p1132_p2 = scmp.lt.s32.totalorder %s1130_s15, %s1124_s12 }
  0x20   : > { %1014 = vmatpush3.bf16.msra.mxu0 %v1104_v9  ;;  %p1126_p13 = pnand %p1125_p12, %p1287_p4  ;;  %p1133_p3 = por %p1132_p2, %p1131_p1 }
  0x21   : > { %1015 = vmatprep.subr.bf16.mxu0 %v1105_v10 }
  0x22   : > { %p1127_p0 = pneg %p1126_p13 }
  0x24   : > { %1016 = vmatpush3.bf16.msra.mxu0 %v1106_v12  ;;  %p1134_p5 = pnand %p1133_p3, %p1127_p0 }
  0x25   : > { %1017 = vmatprep.subr.bf16.mxu0 %v1107_v14 }
  0x28   : > { %1018 = vmatpush3.bf16.msra.mxu0 %v1108_v15 }
  0x29   : > { %1019 = vmatprep.subr.bf16.mxu0 %v1109_v16 }
  0x2c   : > { %1020 = vmatpush3.bf16.msra.mxu0 %v1110_v17 }
  0x2f   : > { %522 = vmatmul.mubr.bf16.vlgmr.msra.gmra.mrb[0].mxu0 %v958_v11 }
  0x97   : > { %v819_v11 = vpop.permute.xlu0 %818 }
 0x102   : > { %v1021_v20 = vpop.f32.mrb[0].mxu0 }
 0x103   : > { %v1022_v21 = vpop.f32.mrb[1].mxu0 }
 0x104   : > { %v1023_v22 = vadd.f32 %v1022_v21, %v1021_v20  ;;  %v1024_v23 = vpop.f32.mrb[2].mxu0 }
 0x105   : > { %v1025_v24 = vpop.f32.mrb[3].mxu0 }
 0x106   : > { %v537_v25 = vpack.c.bf16 %v1023_v22, %v1023_v22 }
 0x108   : > { %1036 = vmatprep.subr.msk.bf16.mxu1 %vm555_vm2, %v537_v25  ;;  %v557_v26 = vsel %vm555_vm2, %v537_v25, 0 }
 0x109   : > { %1031 = vmatpush3.bf16.msra.mxu1 %v557_v26 }
 0x10a   : > { %979 = vmatprep.subr.msk.bf16.mxu1 %vm555_vm2, %v390_v13 }
 0x10c   : > { %1033 = vmatmul.mubr.msk.bf16.vlgmr.msra.gmra.mrb[0].mxu1 %vm548_vm0, %v1112_v27 }
 0x10d   : > { %630 = vmatpush1.bf16.msra.mxu1 %v624_v28  ;;  %661 = vmatprep.mubr.bf16.mxu1 %v1205_v29 }
 0x10e   : > { %774 = vmatprep.subr.bf16.mxu1 %v1115_v32 }
 0x114   : > { %980 = vmatmul.mubr.msk.bf16.vlgmr.msra.gmra.mrb[4].mxu1 %vm548_vm0, %v619_v30 }
 0x115   : > { %806 = vmatprep.mubr.bf16.mxu1 %v1205_v29  ;;  %775 = vmatpush1.bf16.msra.mxu1 %v1113_v31 }
 0x116   : > { %776 = vmatprep.subr.bf16.mxu1 %v1118_v33 }
 0x119   : > { %777 = vmatpush1.bf16.msra.mxu1 %v1116_v34 }
 0x11a   : > { %778 = vmatprep.subr.bf16.mxu1 %v1121_v35 }
 0x11d   : > { %779 = vmatpush1.bf16.msra.mxu1 %v1119_v37 }
 0x11e   : > { %996 = vmatprep.subr.msk.bf16.mxu1 %vm767_vm3, %v995_v38 }
 0x121   : > { %781 = vmatpush1.bf16.msra.mxu1 %v769_v40 }
 0x1df   : > { %v1034_v44 = vpop.f32.mrb[0].mxu1 }
 0x1e0   : > { %v610_v46 = vadd.f32 %v1034_v44, %v531_v42  ;;  %v593_v47 = vpop.f32.mrb[1].mxu1 }
 0x1e1   : > { %v608_v49 = vadd.f32 %v593_v47, %v529_v43  ;;  %v1035_v50 = vpop.f32.mrb[2].mxu1 }
 0x1e2   : > { %615 = vst.msk [vmem:[#allocation2 + $0x10] sm:$0xff] %vm342_vm1, %v610_v46  ;;  %v611_v51 = vadd.f32 %v1035_v50, %v532_v45  ;;  %v596_v52 = vpop.f32.mrb[3].mxu1 }
 0x1e3   : > { %613 = vst.msk [vmem:[#allocation2] sm:$0xff] %vm342_vm1, %v608_v49  ;;  %v609_v53 = vadd.f32 %v596_v52, %v530_v48 }
 0x1e4   : > { %616 = vst.msk [vmem:[#allocation2 + $0x18] sm:$0xff] %vm342_vm1, %v611_v51 }
 0x1e5   : > { %614 = vst.msk [vmem:[#allocation2 + $0x8] sm:$0xff] %vm342_vm1, %v609_v53 }
 0x1e7   : > { %v663_v6 = vpop.f32.mrb[4].mxu1 }
 0x1e8   : > { %v665_v7 = vpop.f32.mrb[5].mxu1 }
 0x1e9   : > { %v679_v58 = vld [vmem:[#allocation2 + $0x10] sm:$0xff]  ;;  %v667_v8 = vpop.f32.mrb[6].mxu1 }
 0x1ea   : > { %v677_v54 = vld [vmem:[#allocation2] sm:$0xff]  ;;  %v707_v1 = vmul.f32 %v985_v59, %v679_v58  ;;  %v668_v9 = vpop.f32.mrb[7].mxu1 }
 0x1eb   : > { %v688_v60 = vmul.f32 %v981_v55, %v677_v54  ;;  %v680_v62 = vld [vmem:[#allocation2 + $0x18] sm:$0xff] }
 0x1ec   : > { %v678_v57 = vld [vmem:[#allocation2 + $0x8] sm:$0xff]  ;;  %v717_v3 = vmul.f32 %v987_v63, %v680_v62 }
 0x1ed   : > { %v697_v61 = vmul.f32 %v983_v56, %v678_v57 }
 0x1ef   : > { %v698_v0 = vadd.f32 %v697_v61, %v688_v60 }
 0x1f1   : > { %v708_v2 = vadd.f32 %v707_v1, %v698_v0 }
 0x1f3   : > { %v718_v4 = vadd.f32 %v717_v3, %v708_v2 }
 0x1f5   : > { %v719_v5 = vpack.c.bf16 %v718_v4, %v718_v4 }
 0x1f7   : > { %997 = vmatmul.mubr.msk.bf16.vlgmr.msra.gmra.mrb[8].mxu1 %vm342_vm1, %v719_v5 }
 0x2ca   : > { %v808_v10 = vpop.f32.mrb[8].mxu1 }
 0x2cb   : > { %v809_v12 = vadd.f32 %v808_v10, %v663_v6  ;;  %v810_v13 = vpop.f32.mrb[9].mxu1 }
 0x2cc   : > { %v811_v14 = vadd.f32 %v810_v13, %v665_v7  ;;  %v812_v15 = vpop.f32.mrb[10].mxu1 }
 0x2cd   : > { %v821_v16 = vadd.f32 %v819_v11, %v809_v12  ;;  %v813_v17 = vpop.f32.mrb[11].mxu1 }
 0x2ce   : > { %v822_v18 = vadd.f32 %v819_v11, %v811_v14 }
 0x2cf   : > { %v823_v19 = vmax.f32 %v821_v16, 0.0 }
 0x2d0   : > { %v824_v20 = vmax.f32 %v822_v18, 0.0 }
 0x2d1   : > { %825 = vst [vmem:[%s319_s20] sm:$0xff] %v823_v19 }
 0x2d2   : > { %826 = vst [vmem:[%s319_s20 + $0x8] sm:$0xff] %v824_v20 }
 0x2d3   : > { %1137 = shalt.err (!%p1134_p5)
}
 0x2d4   : > { %s1138_s16 = scalar_lea.hbm %s1417_s30, 256  ;;  %s1142_s19 = scalar_lea.hbm %s1471_s7, 512 }
 0x2d5   : > { %p1139_p6 = scmp.ne.s32.totalorder %s1417_s30, %s1138_s16  ;;  %p1143_p10 = scmp.lt.u32.totalorder %s1417_s30, %s1471_s7 }
 0x2d6   : > { %p1144_p11 = scmp.lt.u32.totalorder %s1142_s19, %s1138_s16  ;;  %p1146_p13 = scmp.lt.u32.totalorder %s1138_s16, %s1417_s30 }
 0x2d7   : > { %p1140_p7 = pnand %p1139_p6, %p1287_p4 }
 0x2d8   : > { %p1145_p12 = por %p1144_p11, %p1143_p10 }
 0x2d9   : > { %p1141_p9 = pneg %p1140_p7 }
 0x2da   : > { %p1147_p0 = por %p1146_p13, %p1145_p12 }
 0x2dc   : > { %p1148_p1 = pnand %p1147_p0, %p1141_p9 }
 0x2de   : > { %1151 = shalt.err (!%p1148_p1)
}
 0x2df   : > { %1037 = dma.vmem_to_hbm [thread:$0]  (%p1287_p4), %s1419_s21, 256, %s1417_s30, %s828_s10  }
 0x2e0 PF: > { %p1043_p2 = scmp.ge.s32.totalorder %s1202_s29, 2  ;;  %s854_s23 = sand.u32 1, %s1182_s24  }
 0x2e1   : > { %s855_s12 = scalar_lea.sflag [#allocation5], %s854_s23 }
 0x2e2   : > { %p1040_p3 = pnand %p1043_p2, %p1294_p8 }
 0x2e4   : > { %1177 = dma.done.wait (!%p1040_p3), %s855_s12, 256  }
 0x2e5   : > { %1179 = vsyncadd (!%p1040_p3), %s855_s12, 4294967040  ;;  %s20_s29 = sadd.s32 1, %s1202_s29   ;;  %s1474_s24 = smov %s1186_s25 }
 0x2e6   : > { %p17_p5 = scmp.ge.s32.totalorder %s20_s29, 4   ;;  %s1475_s25 = smov %s1190_s26 }
 0x2e7   : > { %s1476_s26 = smov %s1300_s14  ;;  %s1477_s27 = smov %s1198_s28 }
 0x2e8   : > { %s1478_s28 = smov %s1480_s9  ;;  %19 = sbr.rel (!%p17_p5) target bundleno = 4 (0x4), region = 100 }
 0x2ef   :  { %860 = vsyncpa [#allocation5], 1 }
 0x2f0   :  { %862 = vsyncpa [#allocation5 + $0x1], 1 }

</bundles_post_ra>
